<compile_context>
chip_gen: v7x
topology: tpu7x:2x2x1
jax: 0.10.0
libtpu: 0.0.40
codegen_flags: <defaults>
</compile_context>

<pallas_src>
import functools

import jax
import jax.numpy as jnp
from jax.experimental import pallas as pl
from jax.experimental.pallas import tpu as pltpu


def _round_up(x, m):
    return (x + m - 1) // m * m


def _gap_kernel(x_ref, o_ref, acc_ref, *, inv_hw):
    """Process one (TILE_R, TILE_HW) tile; accumulate over hw tiles, finalize on last."""
    k = pl.program_id(1)

    @pl.when(k == 0)
    def _init():
        acc_ref[...] = jnp.zeros_like(acc_ref)

    # Lane-parallel partial reduction: add 128-lane chunks with pure VPU adds
    # (no cross-lane XLU work in the hot loop).
    n_chunks = x_ref.shape[1] // 128
    part = acc_ref[...]                                    # (TILE_R, 128) f32
    for j in range(n_chunks):                              # static unroll
        part = part + x_ref[:, j * 128:(j + 1) * 128].astype(jnp.float32)
    acc_ref[...] = part

    @pl.when(k == pl.num_programs(1) - 1)
    def _finalize():
        # Single 128-wide finish on the MXU, then scale by 1/(H*W).
        ones = jnp.ones((128, 1), jnp.float32)
        row_sum = jnp.dot(acc_ref[...], ones, preferred_element_type=jnp.float32)
        o_ref[...] = (row_sum * inv_hw).astype(o_ref.dtype)


def global_avg_pool2d(x, *, max_tile_hw=2048, target_tile_bytes=2 * 1024 * 1024,
                      max_tile_r=2048):
    """Equivalent of F.avg_pool2d(x, kernel_size=x.shape[2:]) for NCHW input."""
    n, c, h, w = x.shape
    rows, hw = n * c, h * w
    itemsize = jnp.dtype(x.dtype).itemsize
    # Sublane packing: f32 -> 8, bf16/f16 -> 16, int8/fp8 -> 32.
    sub = max(8, 32 // itemsize)

    # --- spatial (lane) tiling: multiples of 128, minimal padding ---
    hw128 = _round_up(hw, 128)
    n_hw_tiles = pl.cdiv(hw128, max_tile_hw)
    tile_hw = _round_up(pl.cdiv(hw128, n_hw_tiles), 128)
    n_hw_tiles = pl.cdiv(hw128, tile_hw)
    hw_pad = n_hw_tiles * tile_hw

    # --- row (sublane) tiling: fill ~target_tile_bytes per input buffer ---
    tile_r = max(sub, (target_tile_bytes // (tile_hw * itemsize)) // sub * sub)
    tile_r = min(tile_r, max_tile_r, _round_up(rows, sub))
    rows_pad = _round_up(rows, tile_r)
    n_r_tiles = rows_pad // tile_r

    x2d = x.reshape(rows, hw)
    if rows_pad != rows or hw_pad != hw:
        # Zero padding keeps row sums exact; the divisor below is the true H*W.
        x2d = jnp.pad(x2d, ((0, rows_pad - rows), (0, hw_pad - hw)))

    kernel = functools.partial(_gap_kernel, inv_hw=1.0 / hw)

    out2d = pl.pallas_call(
        kernel,
        out_shape=jax.ShapeDtypeStruct((rows_pad, 1), x.dtype),
        grid=(n_r_tiles, n_hw_tiles),
        in_specs=[pl.BlockSpec((tile_r, tile_hw), lambda i, k: (i, k))],
        out_specs=pl.BlockSpec((tile_r, 1), lambda i, k: (i, 0)),
        scratch_shapes=[pltpu.VMEM((tile_r, 128), jnp.float32)],
        compiler_params=pltpu.CompilerParams(
            dimension_semantics=("parallel", "arbitrary")),
        cost_estimate=pl.CostEstimate(
            flops=rows_pad * hw_pad,
            transcendentals=0,
            bytes_accessed=rows_pad * hw_pad * itemsize + rows_pad * itemsize),
    )(x2d)

    return out2d[:rows].reshape(n, c, 1, 1)


if __name__ == "__main__":
    key = jax.random.PRNGKey(0)
    x = jax.random.normal(key, (2, 4, 16, 16), dtype=jnp.float32)

    out = global_avg_pool2d(x)
    jax.block_until_ready(out)

    ref = jnp.mean(x, axis=(2, 3), keepdims=True)
    assert out.shape == (2, 4, 1, 1)
    assert jnp.allclose(out, ref, atol=1e-5, rtol=1e-5)

    # Extra check: exercises the row/hw zero-padding path (rows=6, hw=49).
    x2 = jax.random.normal(jax.random.PRNGKey(0), (2, 3, 7, 7), dtype=jnp.float32)
    out2 = global_avg_pool2d(x2)
    jax.block_until_ready(out2)
    ref2 = jnp.mean(x2, axis=(2, 3), keepdims=True)
    assert out2.shape == (2, 3, 1, 1)
    assert jnp.allclose(out2, ref2, atol=1e-5, rtol=1e-5)

    print("KERNEL_OK")
</pallas_src>

<mosaic_0001>
module attributes {stable_mosaic.version = 11 : i64} {
  func.func @_gap_kernel(%arg0: i32, %arg1: i32, %arg2: memref<8x256xf32, #tpu.memory_space<vmem>>, %arg3: memref<8x1xf32, #tpu.memory_space<vmem>>, %arg4: memref<8x128xf32, #tpu.memory_space<vmem>>) attributes {dimension_semantics = [#tpu.dimension_semantics<parallel>, #tpu.dimension_semantics<arbitrary>], iteration_bounds = array<i64: 1, 1>, scalar_prefetch = 0 : i64, scratch_operands = 1 : i64, tpu.core_type = #tpu.core_type<tc>, window_params = [{transform_indices = @transform_0, window_bounds = array<i64: 8, 256>}, {transform_indices = @transform_1, window_bounds = array<i64: 8, 1>}]} {
    %c0_i32 = arith.constant 0 : i32
    %0 = arith.cmpi eq, %arg1, %c0_i32 : i32
    %1 = arith.extui %0 : i1 to i32
    %c0_i32_0 = arith.constant 0 : i32
    %2 = arith.cmpi ne, %1, %c0_i32_0 : i32
    scf.if %2 {
      %cst = arith.constant 0.000000e+00 : f32
      %12 = vector.broadcast %cst : f32 to vector<8x128xf32>
      %c0_9 = arith.constant 0 : index
      %c0_10 = arith.constant 0 : index
      %13 = vector.load %arg4[%c0_9, %c0_10] : memref<8x128xf32, #tpu.memory_space<vmem>>, vector<8x128xf32>
      tpu.vector_store %arg4[%c0_9, %c0_10], %12 {strides = array<i32>} : memref<8x128xf32, #tpu.memory_space<vmem>>, vector<8x128xf32>,
    } else {
    }
    %c0 = arith.constant 0 : index
    %c0_1 = arith.constant 0 : index
    %3 = vector.load %arg4[%c0, %c0_1] : memref<8x128xf32, #tpu.memory_space<vmem>>, vector<8x128xf32>
    %c0_2 = arith.constant 0 : index
    %c0_3 = arith.constant 0 : index
    %4 = vector.load %arg2[%c0_2, %c0_3] : memref<8x256xf32, #tpu.memory_space<vmem>>, vector<8x128xf32>
    %5 = arith.addf %3, %4 : vector<8x128xf32>
    %c0_4 = arith.constant 0 : index
    %c128 = arith.constant 128 : index
    %6 = vector.load %arg2[%c0_4, %c128] : memref<8x256xf32, #tpu.memory_space<vmem>>, vector<8x128xf32>
    %7 = arith.addf %5, %6 : vector<8x128xf32>
    %c0_5 = arith.constant 0 : index
    %c0_6 = arith.constant 0 : index
    %8 = vector.load %arg4[%c0_5, %c0_6] : memref<8x128xf32, #tpu.memory_space<vmem>>, vector<8x128xf32>
    tpu.vector_store %arg4[%c0_5, %c0_6], %7 {strides = array<i32>} : memref<8x128xf32, #tpu.memory_space<vmem>>, vector<8x128xf32>,
    %c0_i32_7 = arith.constant 0 : i32
    %9 = arith.cmpi eq, %arg1, %c0_i32_7 : i32
    %10 = arith.extui %9 : i1 to i32
    %c0_i32_8 = arith.constant 0 : i32
    %11 = arith.cmpi ne, %10, %c0_i32_8 : i32
    scf.if %11 {
      %cst = arith.constant 1.000000e+00 : f32
      %12 = vector.broadcast %cst : f32 to vector<128x1xf32>
      %c0_9 = arith.constant 0 : index
      %c0_10 = arith.constant 0 : index
      %13 = vector.load %arg4[%c0_9, %c0_10] : memref<8x128xf32, #tpu.memory_space<vmem>>, vector<8x128xf32>
      %cst_11 = arith.constant dense<0.000000e+00> : vector<8x1xf32>
      %14 = tpu.matmul %13, %12, %cst_11 {dimension_numbers = #tpu.dot_dimension_numbers<[1], [0], [0], [1], [0, 0, 1, 1], [], []>} : vector<8x128xf32>, vector<128x1xf32>, vector<8x1xf32> -> vector<8x1xf32>
      %cst_12 = arith.constant 3.906250e-03 : f32
      %15 = vector.broadcast %cst_12 : f32 to vector<8x1xf32>
      %16 = arith.mulf %14, %15 : vector<8x1xf32>
      %c0_13 = arith.constant 0 : index
      %c0_14 = arith.constant 0 : index
      %17 = vector.load %arg3[%c0_13, %c0_14] : memref<8x1xf32, #tpu.memory_space<vmem>>, vector<8x1xf32>
      tpu.vector_store %arg3[%c0_13, %c0_14], %16 {strides = array<i32>} : memref<8x1xf32, #tpu.memory_space<vmem>>, vector<8x1xf32>,
    } else {
    }
    return
  }
  func.func @transform_0(%arg0: i32, %arg1: i32) -> (i32, i32) {
    %c0_i32 = arith.constant 0 : i32
    return %arg0, %arg1 : i32, i32
  }
  func.func @transform_1(%arg0: i32, %arg1: i32) -> (i32, i32) {
    %c0_i32 = arith.constant 0 : i32
    %c0_i32_0 = arith.constant 0 : i32
    return %arg0, %c0_i32 : i32, i32
  }
}

</mosaic_0001>

<bundles_post_ra>
// kernel: tpu_custom_call.1
= control target key start
LH: loop header
LB: loop body
LE: loop exit
PB: predicated region body
PF: predicated region fallthrough
CT: control target
= control target key end

     0   :  { %6 = vsyncpa [#allocation4], 0  ;;  %s210_s6 = smov [#allocation3]   ;;  %s240_s0 = inlined_call_operand.hbm [shape: f32[8,256], index: 0, kind: input, shape index: {}]   ;;  %s241_s1 = inlined_call_operand.vmem [shape: f32[8,1], index: 1, kind: output, shape index: {}]  }
   0x1   :  { %s13_s7 = sshll.u32 %s210_s6, 4  ;;  %s186_s10 = scalar_lea.hbm %s240_s0, 256  ;;  %s14_s7 = int_to_ptr.vmem [resolvable:$true] %s13_s7 }
   0x2   :  { %p187_p0 = scmp.ne.s32.totalorder %s240_s0, %s186_s10  ;;  %p190_p1 = scmp.lt.u32.totalorder %s186_s10, %s240_s0 }
   0x4   :  { %p192_p2 = pnand %p190_p1, %p187_p0 }
   0x6   :  { %195 = shalt.err (!%p192_p2)
}
   0x7   :  { %s196_s15 = scalar_lea.vmem %s14_s7, 256  ;;  %p201_p4 = scmp.lt.s32.totalorder %s14_s7, %s14_s7 }
   0x8   :  { %p197_p3 = scmp.ne.s32.totalorder %s14_s7, %s196_s15  ;;  %p202_p5 = scmp.lt.s32.totalorder %s196_s15, %s196_s15 }
   0xa   :  { %p203_p6 = por %p202_p5, %p201_p4 }
   0xc   :  { %p204_p7 = pnand %p203_p6, %p197_p3 }
   0xe   :  { %207 = shalt.err (!%p204_p7)
}
   0xf   :  { %16 = dma.hbm_to_vmem [thread:$0]  %s240_s0, 256, %s14_s7, [#allocation4]  }
  0x10   :  { %208 = dma.done.wait [#allocation4], 256  }
  0x11   :  { %209 = vsyncadd [#allocation4], 4294967040  ;;  %v211_v0 = vmov 0.0|0.0   ;;  %v212_v1 = vmov 1.0|1.0   ;;  %vm213_vm0 = vmmov 0  }
  0x12   :  { %165 = vmatprep.subr.bf16.mxu0 %v211_v0  ;;  %v214_v2 = vmov 0.0   ;;  %v26_v3 = vld [vmem:[#allocation3] sm:$0xff]  ;;  %v28_v4 = vld [vmem:[#allocation3 + $0x8] sm:$0xff]  ;;  %vm106_vm1 = vcmask 7168  }
  0x13   :  { %166 = vmatpush3.bf16.msra.mxu0 %v212_v1  ;;  %162 = vmatprep.mubr.msk.f32.mxu0 %vm213_vm0, %v214_v2  ;;  %v29_v5 = vadd.f32 %v28_v4, %v26_v3 }
  0x14   :  { %167 = vmatprep.subr.bf16.mxu0 %v211_v0 }
  0x17   :  { %168 = vmatpush3.bf16.msra.mxu0 %v212_v1 }
  0x18   :  { %169 = vmatprep.subr.bf16.mxu0 %v211_v0 }
  0x1b   :  { %170 = vmatpush3.bf16.msra.mxu0 %v212_v1 }
  0x1c   :  { %171 = vmatprep.subr.bf16.mxu0 %v211_v0 }
  0x1f   :  { %172 = vmatpush3.bf16.msra.mxu0 %v212_v1 }
  0x20   :  { %173 = vmatprep.subr.bf16.mxu0 %v211_v0 }
  0x23   :  { %174 = vmatpush3.bf16.msra.mxu0 %v212_v1 }
  0x24   :  { %175 = vmatprep.subr.bf16.mxu0 %v211_v0 }
  0x27   :  { %176 = vmatpush3.bf16.msra.mxu0 %v212_v1 }
  0x28   :  { %177 = vmatprep.subr.bf16.mxu0 %v211_v0 }
  0x2b   :  { %178 = vmatpush3.bf16.msra.mxu0 %v212_v1 }
  0x2c   :  { %179 = vmatprep.subr.bf16.mxu0 %v211_v0 }
  0x2f   :  { %180 = vmatpush3.bf16.msra.mxu0 %v212_v1 }
  0x32   :  { %163 = vmatmul.mubr.f32.vlgmr.msra.gmra.mrb[0].mxu0 %v29_v5 }
 0x105   :  { %v101_v6 = vpop.f32.mrb[0].mxu0 }
 0x106   :  { %v105_v7 = vmul.f32 0.00390625, %v101_v6  ;;  %v164_v8 = vpop.f32.mrb[1].mxu0 }
 0x108   :  { %107 = vst.msk [vmem:[%s241_s1] sm:$0xff] %vm106_vm1, %v105_v7 }
 0x109   :  { %112 = vsyncpa [#allocation4], 1 }

</bundles_post_ra>
